<compile_context>
chip_gen: v7x
topology: tpu7x:2x2x1
jax: 0.10.0
libtpu: 0.0.40
codegen_flags: <defaults>
</compile_context>

<pallas_src>
import functools

import jax
import jax.numpy as jnp
from jax.experimental import pallas as pl
from jax.experimental.pallas import tpu as pltpu

LANE = 128                      # TPU lane width: feature dims padded to this.
MAX_TB = 2048                   # hard cap on batch-tile rows.
VMEM_BUDGET = 40 * 1024 * 1024  # sizing budget: comfortably inside v7x 64 MiB.


def _round_up(n, m):
    return ((n + m - 1) // m) * m


def _cdiv(a, b):
    return (a + b - 1) // b


def mlp_kernel(x_ref, w1_ref, b1_ref, w2_ref, b2_ref, w3_ref, b3_ref, o_ref):
    """One batch tile of fc1+ReLU -> fc2+ReLU -> fc3, fully fused in VMEM."""
    cd = w1_ref.dtype                     # matmul-input dtype (f32 or bf16)
    x = x_ref[...].astype(cd)             # cast in-kernel: no wrapper HBM pass
    h1 = jnp.dot(x, w1_ref[...], preferred_element_type=jnp.float32) + b1_ref[...]
    h1 = jnp.maximum(h1, 0.0).astype(cd)  # bias/ReLU in f32, cast for MXU
    h2 = jnp.dot(h1, w2_ref[...], preferred_element_type=jnp.float32) + b2_ref[...]
    h2 = jnp.maximum(h2, 0.0).astype(cd)
    out = jnp.dot(h2, w3_ref[...], preferred_element_type=jnp.float32) + b3_ref[...]
    o_ref[...] = out.astype(o_ref.dtype)


def _resident_spec(a):
    """Constant block index -> one DMA, stays resident in VMEM.
    Single-buffered: the block never changes, so no second buffer is needed."""
    if hasattr(pl, "Buffered"):
        return pl.BlockSpec(a.shape, lambda i: (0,) * a.ndim,
                            pipeline_mode=pl.Buffered(1))
    return pl.BlockSpec(a.shape, lambda i: (0,) * a.ndim)


def prepare_params(params, compute_dtype=jnp.float32):
    """One-time param prep: zero-pad feature dims to lane multiples (identical
    math) and cast weights to the matmul dtype (f32 or bf16 — bf16 is fine on
    v5e/v6e/v7x since accumulation and bias/ReLU stay f32). Biases stay f32."""
    w1, b1, w2, b2, w3, b3 = (params["w1"], params["b1"], params["w2"],
                              params["b2"], params["w3"], params["b3"])
    IN, H1 = w1.shape
    H2 = w2.shape[1]
    OUT = w3.shape[1]
    H1P, H2P, OUTP = (_round_up(d, LANE) for d in (H1, H2, OUT))

    def pad_w(w, rp, cp):
        r, c = w.shape
        return jnp.zeros((rp, cp), compute_dtype).at[:r, :c].set(
            w.astype(compute_dtype))

    def pad_b(b, cp):
        return jnp.zeros((1, cp), jnp.float32).at[:, :b.shape[1]].set(
            b.astype(jnp.float32))

    padded = {
        "w1": pad_w(w1, IN, H1P),   "b1": pad_b(b1, H1P),
        "w2": pad_w(w2, H1P, H2P),  "b2": pad_b(b2, H2P),
        "w3": pad_w(w3, H2P, OUTP), "b3": pad_b(b3, OUTP),
    }
    return padded, OUT


@functools.partial(jax.jit, static_argnames=("out_num", "out_dtype", "tb"))
def neural_net_forward(x, padded, *, out_num, out_dtype=jnp.float32, tb=None):
    """x: [B, input_num] float32. padded: output of prepare_params."""
    w1, b1 = padded["w1"], padded["b1"]
    w2, b2 = padded["w2"], padded["b2"]
    w3, b3 = padded["w3"], padded["b3"]
    B, IN = x.shape
    H1P, H2P, OUTP = w1.shape[1], w2.shape[1], w3.shape[1]
    cd_bytes = jnp.dtype(w1.dtype).itemsize
    x_bytes = jnp.dtype(x.dtype).itemsize
    out_bytes = jnp.dtype(out_dtype).itemsize

    # ---- batch-tile sizing: largest tile that fits the VMEM budget ----------
    # sublane granularity of the tiled (batch) dim; driven by the narrowest
    # HBM-tiled dtype (x is f32; output may be bf16).
    sub = 16 if out_bytes < 4 else 8
    weight_bytes = sum(int(a.size) * jnp.dtype(a.dtype).itemsize
                       for a in (w1, b1, w2, b2, w3, b3))   # single-buffered
    per_row = (2 * IN * x_bytes                  # double-buffered x tile
               + 2 * OUTP * out_bytes            # double-buffered out tile
               + (H1P + H2P) * 4                 # f32 h1/h2 temporaries
               + (IN + H1P + H2P) * cd_bytes)    # compute-dtype activation copies
    avail = max(VMEM_BUDGET - weight_bytes, per_row * sub)

    if tb is None:
        tb_fit = min(MAX_TB, max(sub, (avail // per_row) // sub * sub))
        if tb_fit >= B:
            # Whole batch fits one tile; split in two (sublane-aligned) when
            # big enough so both v7x TensorCores get work. On 1-TC chips the
            # extra grid step costs ~0.35 us — negligible.
            tb = _round_up(_cdiv(B, 2), sub) if B >= 4 * sub else B
        else:
            tb = tb_fit
    else:
        tb = min(int(tb), B)
        if tb < B:
            tb = max(sub, (tb // sub) * sub)

    # Ragged last tile: out-of-range rows read unspecified data, never mix into
    # valid rows (row-wise matmul), and are dropped on the masked output write.
    grid = (_cdiv(B, tb),)

    needed = weight_bytes + tb * per_row + (2 << 20)
    vmem_limit = int(min(max(needed + (4 << 20), 32 << 20), 100 << 20))

    flops = 2 * B * (IN * H1P + H1P * H2P + H2P * OUTP)
    bytes_accessed = B * IN * x_bytes + weight_bytes + B * OUTP * out_bytes
    cost = pl.CostEstimate(flops=flops, transcendentals=0,
                           bytes_accessed=bytes_accessed)

    out = pl.pallas_call(
        mlp_kernel,
        out_shape=jax.ShapeDtypeStruct((B, OUTP), out_dtype),
        grid=grid,
        in_specs=[
            pl.BlockSpec((tb, IN), lambda i: (i, 0)),   # x streamed per tile
            _resident_spec(w1), _resident_spec(b1),
            _resident_spec(w2), _resident_spec(b2),
            _resident_spec(w3), _resident_spec(b3),
        ],
        out_specs=pl.BlockSpec((tb, OUTP), lambda i: (i, 0)),
        compiler_params=pltpu.CompilerParams(
            # Independent batch tiles -> shard across v7x's two TensorCores.
            dimension_semantics=("parallel",),
            vmem_limit_bytes=vmem_limit,
        ),
        cost_estimate=cost,
    )(x, w1, b1, w2, b2, w3, b3)

    # Drop the lane padding of the output features (batch is already exact).
    return out[:, :out_num]


def init_params(key, input_num, hidden1_num, hidden2_num, output_num):
    """Deterministic init mimicking PyTorch Linear's U(-1/sqrt(fan_in), +).
    Weights stored already transposed: [fan_in, fan_out] (x @ W + b)."""
    ks = jax.random.split(key, 6)

    def linear(kw, kb, fan_in, fan_out):
        bound = 1.0 / jnp.sqrt(fan_in)
        w = jax.random.uniform(kw, (fan_in, fan_out), jnp.float32, -bound, bound)
        b = jax.random.uniform(kb, (1, fan_out), jnp.float32, -bound, bound)
        return w, b

    w1, b1 = linear(ks[0], ks[1], input_num, hidden1_num)
    w2, b2 = linear(ks[2], ks[3], hidden1_num, hidden2_num)
    w3, b3 = linear(ks[4], ks[5], hidden2_num, output_num)
    return {"w1": w1, "b1": b1, "w2": w2, "b2": b2, "w3": w3, "b3": b3}


if __name__ == "__main__":
    key = jax.random.PRNGKey(0)
    k_x, k_p = jax.random.split(key)

    # Small shapes, batch big enough to exercise the batch grid and the ragged
    # last tile (B=200 -> 2 tiles, last one partial).
    B, input_num, hidden1_num, hidden2_num, output_num = 200, 32, 64, 64, 16
    x = jax.random.normal(k_x, (B, input_num), jnp.float32)
    params = init_params(k_p, input_num, hidden1_num, hidden2_num, output_num)

    # Plain-JAX reference on the unpadded params.
    h1 = jnp.maximum(x @ params["w1"] + params["b1"], 0.0)
    h2 = jnp.maximum(h1 @ params["w2"] + params["b2"], 0.0)
    ref = h2 @ params["w3"] + params["b3"]

    # f32 path (matches reference closely).
    padded_f32, out_num = prepare_params(params, jnp.float32)
    out_f32 = neural_net_forward(x, padded_f32, out_num=out_num)
    jax.block_until_ready(out_f32)
    assert out_f32.shape == (B, output_num)
    assert jnp.allclose(out_f32, ref, atol=1e-5, rtol=1e-5)

    # bf16 weights + in-kernel bf16 activations + bf16 output (f32 accumulate).
    padded_bf16, _ = prepare_params(params, jnp.bfloat16)
    out_bf16 = neural_net_forward(x, padded_bf16, out_num=out_num,
                                  out_dtype=jnp.bfloat16)
    jax.block_until_ready(out_bf16)
    assert out_bf16.shape == (B, output_num)
    assert out_bf16.dtype == jnp.bfloat16
    assert jnp.allclose(out_bf16.astype(jnp.float32), ref, atol=1e-1, rtol=1e-1)

    print("KERNEL_OK")
</pallas_src>

<mosaic_0001>
module attributes {stable_mosaic.version = 11 : i64} {
  func.func @mlp_kernel(%arg0: i32, %arg1: memref<104x32xf32, #tpu.memory_space<vmem>>, %arg2: memref<32x128xf32, #tpu.memory_space<vmem>>, %arg3: memref<1x128xf32, #tpu.memory_space<vmem>>, %arg4: memref<128x128xf32, #tpu.memory_space<vmem>>, %arg5: memref<1x128xf32, #tpu.memory_space<vmem>>, %arg6: memref<128x128xf32, #tpu.memory_space<vmem>>, %arg7: memref<1x128xf32, #tpu.memory_space<vmem>>, %arg8: memref<104x128xf32, #tpu.memory_space<vmem>>) attributes {dimension_semantics = [#tpu.dimension_semantics<parallel>], iteration_bounds = array<i64: 2>, scalar_prefetch = 0 : i64, scratch_operands = 0 : i64, tpu.core_type = #tpu.core_type<tc>, window_params = [{transform_indices = @transform_0, window_bounds = array<i64: 104, 32>}, {pipeline_mode = #tpu.pipeline_mode<synchronous>, transform_indices = @transform_1, window_bounds = array<i64: 32, 128>}, {pipeline_mode = #tpu.pipeline_mode<synchronous>, transform_indices = @transform_2, window_bounds = array<i64: 1, 128>}, {pipeline_mode = #tpu.pipeline_mode<synchronous>, transform_indices = @transform_3, window_bounds = array<i64: 128, 128>}, {pipeline_mode = #tpu.pipeline_mode<synchronous>, transform_indices = @transform_4, window_bounds = array<i64: 1, 128>}, {pipeline_mode = #tpu.pipeline_mode<synchronous>, transform_indices = @transform_5, window_bounds = array<i64: 128, 128>}, {pipeline_mode = #tpu.pipeline_mode<synchronous>, transform_indices = @transform_6, window_bounds = array<i64: 1, 128>}, {transform_indices = @transform_7, window_bounds = array<i64: 104, 128>}]} {
    %c0 = arith.constant 0 : index
    %c0_0 = arith.constant 0 : index
    %0 = vector.load %arg1[%c0, %c0_0] : memref<104x32xf32, #tpu.memory_space<vmem>>, vector<104x32xf32>
    %c0_1 = arith.constant 0 : index
    %c0_2 = arith.constant 0 : index
    %1 = vector.load %arg2[%c0_1, %c0_2] : memref<32x128xf32, #tpu.memory_space<vmem>>, vector<32x128xf32>
    %cst = arith.constant dense<0.000000e+00> : vector<104x128xf32>
    %2 = tpu.matmul %0, %1, %cst {dimension_numbers = #tpu.dot_dimension_numbers<[1], [0], [0], [1], [0, 0, 1, 1], [], []>} : vector<104x32xf32>, vector<32x128xf32>, vector<104x128xf32> -> vector<104x128xf32>
    %c0_3 = arith.constant 0 : index
    %c0_4 = arith.constant 0 : index
    %3 = vector.load %arg3[%c0_3, %c0_4] : memref<1x128xf32, #tpu.memory_space<vmem>>, vector<1x128xf32>
    %4 = vector.broadcast %3 : vector<1x128xf32> to vector<104x128xf32>
    %5 = arith.addf %2, %4 : vector<104x128xf32>
    %cst_5 = arith.constant 0.000000e+00 : f32
    %6 = vector.broadcast %cst_5 : f32 to vector<104x128xf32>
    %7 = arith.maximumf %5, %6 : vector<104x128xf32>
    %c0_6 = arith.constant 0 : index
    %c0_7 = arith.constant 0 : index
    %8 = vector.load %arg4[%c0_6, %c0_7] : memref<128x128xf32, #tpu.memory_space<vmem>>, vector<128x128xf32>
    %cst_8 = arith.constant dense<0.000000e+00> : vector<104x128xf32>
    %9 = tpu.matmul %7, %8, %cst_8 {dimension_numbers = #tpu.dot_dimension_numbers<[1], [0], [0], [1], [0, 0, 1, 1], [], []>} : vector<104x128xf32>, vector<128x128xf32>, vector<104x128xf32> -> vector<104x128xf32>
    %c0_9 = arith.constant 0 : index
    %c0_10 = arith.constant 0 : index
    %10 = vector.load %arg5[%c0_9, %c0_10] : memref<1x128xf32, #tpu.memory_space<vmem>>, vector<1x128xf32>
    %11 = vector.broadcast %10 : vector<1x128xf32> to vector<104x128xf32>
    %12 = arith.addf %9, %11 : vector<104x128xf32>
    %cst_11 = arith.constant 0.000000e+00 : f32
    %13 = vector.broadcast %cst_11 : f32 to vector<104x128xf32>
    %14 = arith.maximumf %12, %13 : vector<104x128xf32>
    %c0_12 = arith.constant 0 : index
    %c0_13 = arith.constant 0 : index
    %15 = vector.load %arg6[%c0_12, %c0_13] : memref<128x128xf32, #tpu.memory_space<vmem>>, vector<128x128xf32>
    %cst_14 = arith.constant dense<0.000000e+00> : vector<104x128xf32>
    %16 = tpu.matmul %14, %15, %cst_14 {dimension_numbers = #tpu.dot_dimension_numbers<[1], [0], [0], [1], [0, 0, 1, 1], [], []>} : vector<104x128xf32>, vector<128x128xf32>, vector<104x128xf32> -> vector<104x128xf32>
    %c0_15 = arith.constant 0 : index
    %c0_16 = arith.constant 0 : index
    %17 = vector.load %arg7[%c0_15, %c0_16] : memref<1x128xf32, #tpu.memory_space<vmem>>, vector<1x128xf32>
    %18 = vector.broadcast %17 : vector<1x128xf32> to vector<104x128xf32>
    %19 = arith.addf %16, %18 : vector<104x128xf32>
    %c0_17 = arith.constant 0 : index
    %c0_18 = arith.constant 0 : index
    %20 = vector.load %arg8[%c0_17, %c0_18] : memref<104x128xf32, #tpu.memory_space<vmem>>, vector<104x128xf32>
    tpu.vector_store %arg8[%c0_17, %c0_18], %19 {strides = array<i32>} : memref<104x128xf32, #tpu.memory_space<vmem>>, vector<104x128xf32>,
    return
  }
  func.func @transform_0(%arg0: i32) -> (i32, i32) {
    %c0_i32 = arith.constant 0 : i32
    %c0_i32_0 = arith.constant 0 : i32
    return %arg0, %c0_i32 : i32, i32
  }
  func.func @transform_1(%arg0: i32) -> (i32, i32) {
    %c0_i32 = arith.constant 0 : i32
    %c0_i32_0 = arith.constant 0 : i32
    %c0_i32_1 = arith.constant 0 : i32
    return %c0_i32, %c0_i32_0 : i32, i32
  }
  func.func @transform_2(%arg0: i32) -> (i32, i32) {
    %c0_i32 = arith.constant 0 : i32
    %c0_i32_0 = arith.constant 0 : i32
    %c0_i32_1 = arith.constant 0 : i32
    return %c0_i32, %c0_i32_0 : i32, i32
  }
  func.func @transform_3(%arg0: i32) -> (i32, i32) {
    %c0_i32 = arith.constant 0 : i32
    %c0_i32_0 = arith.constant 0 : i32
    %c0_i32_1 = arith.constant 0 : i32
    return %c0_i32, %c0_i32_0 : i32, i32
  }
  func.func @transform_4(%arg0: i32) -> (i32, i32) {
    %c0_i32 = arith.constant 0 : i32
    %c0_i32_0 = arith.constant 0 : i32
    %c0_i32_1 = arith.constant 0 : i32
    return %c0_i32, %c0_i32_0 : i32, i32
  }
  func.func @transform_5(%arg0: i32) -> (i32, i32) {
    %c0_i32 = arith.constant 0 : i32
    %c0_i32_0 = arith.constant 0 : i32
    %c0_i32_1 = arith.constant 0 : i32
    return %c0_i32, %c0_i32_0 : i32, i32
  }
  func.func @transform_6(%arg0: i32) -> (i32, i32) {
    %c0_i32 = arith.constant 0 : i32
    %c0_i32_0 = arith.constant 0 : i32
    %c0_i32_1 = arith.constant 0 : i32
    return %c0_i32, %c0_i32_0 : i32, i32
  }
  func.func @transform_7(%arg0: i32) -> (i32, i32) {
    %c0_i32 = arith.constant 0 : i32
    %c0_i32_0 = arith.constant 0 : i32
    return %arg0, %c0_i32 : i32, i32
  }
}

</mosaic_0001>

<bundles_post_ra>
// kernel: neural_net_forward.1
= control target key start
LH: loop header
LB: loop body
LE: loop exit
PB: predicated region body
PF: predicated region fallthrough
CT: control target
= control target key end

     0   :  { %12 = vsyncpa [#allocation3], 0  ;;  %s1765_s24 = smov 0   ;;  %s1767_s25 = smov 0   ;;  %s2203_s0 = inlined_call_operand.vmem [shape: f32[200,32], index: 0, kind: input, shape index: {}]   ;;  %s2204_s1 = inlined_call_operand.hbm [shape: f32[32,128], index: 1, kind: input, shape index: {}]   ;;  %s2205_s2 = inlined_call_operand.vmem [shape: f32[1,128], index: 2, kind: input, shape index: {}]   ;;  %s2206_s3 = inlined_call_operand.vmem [shape: f32[128,128], index: 3, kind: input, shape index: {}]   ;;  %s2207_s4 = inlined_call_operand.vmem [shape: f32[1,128], index: 4, kind: input, shape index: {}]   ;;  %s2208_s5 = inlined_call_operand.vmem [shape: f32[128,128], index: 5, kind: input, shape index: {}]   ;;  %s2209_s6 = inlined_call_operand.vmem [shape: f32[1,128], index: 6, kind: input, shape index: {}]   ;;  %s2210_s7 = inlined_call_operand.vmem [shape: f32[200,128], index: 7, kind: output, shape index: {}]  }
   0x1   :  { %s1769_s26 = smov 0  }
   0x2 LB: > { %s1778_s27 = sadd.s32 4294967295, %s1685_s26   ;;  %s1780_s28 = sadd.s32 1, %s1685_s26   ;;  %s1685_s26 = sphi %s1769_s26, %s2225_s26   ;;  %s1681_s25 = sphi %s1767_s25, %s2224_s25   ;;  %s1677_s24 = sphi %s1765_s24, %s2223_s24  }
   0x3   : > { %s174_s29 = ssub.s32 %s1685_s26, %s1780_s28  ;;  %s177_s30 = sadd.s32 1, %s1681_s25 }
   0x4   : > { %p175_p0 = scmp.eq.s32.totalorder %s174_s29, 0  ;;  %p187_p1 = scmp.ne.s32.totalorder %s1681_s25, %s1677_s24 }
   0x5   : > { %p188_p2 = scmp.eq.s32.totalorder %s1778_s27, 1  ;;  %p1132_p3 = scmp.ge.s32.totalorder %s1685_s26, 1 }
   0x6   : > { %s1788_s8 = scalar_select %p175_p0, %s1681_s25, %s177_s30  }
   0x7   : > { %p1790_p4 = por %p188_p2, %p187_p1  ;;  %p201_p5 = scmp.lt.s32.totalorder %s1685_s26, 3 }
   0x8   : > { %p2211_p6 = scmp.eq.s32.totalorder %s1778_s27, 0  ;;  %s1719_s11 = smov [#allocation2]  }
   0x9   : > { %s2213_s9 = scalar_select %p1790_p4, 1, 0 }
   0xa   : > { %p1795_p7 = pnand %p1132_p3, %p201_p5  ;;  %s213_s12 = sshll.u32 %s1719_s11, 4  ;;  %s214_s12 = int_to_ptr.vmem [resolvable:$true] %s213_s12 }
   0xb   : > { %s1599_s16 = scalar_lea.hbm %s2204_s1, 512 }
   0xc   : > { %s2214_s10 = scalar_select %p1795_p7, 1, 0 }
   0xd   : > { %p1494_p8 = pneg %p1795_p7  ;;  %p1600_p10 = scmp.ne.s32.totalorder %s2204_s1, %s1599_s16 }
   0xe   : > { %p1606_p0 = scmp.lt.u32.totalorder %s1599_s16, %s2204_s1 }
   0xf   : > { %p1803_p9 = pnand %p2211_p6, %p1494_p8 }
  0x11   : > { %p1601_p11 = pneg %p1803_p9 }
  0x13   : > { %p1602_p12 = pnand %p1601_p11, %p1600_p10 }
  0x15   : > { %p1603_p13 = pneg %p1602_p12 }
  0x17   : > { %p1608_p1 = pnand %p1606_p0, %p1603_p13 }
  0x19   : > { %1611 = shalt.err (!%p1608_p1)
}
  0x1a   : > { %s1612_s21 = scalar_lea.vmem %s214_s12, 512  ;;  %p1620_p8 = scmp.lt.s32.totalorder %s214_s12, %s214_s12 }
  0x1b   : > { %p1613_p2 = scmp.ne.s32.totalorder %s214_s12, %s1612_s21  ;;  %p1621_p6 = scmp.lt.s32.totalorder %s1612_s21, %s1612_s21 }
  0x1d   : > { %p1615_p3 = pnand %p1613_p2, %p1601_p11  ;;  %p1622_p4 = por %p1621_p6, %p1620_p8 }
  0x1f   : > { %p1616_p5 = pneg %p1615_p3 }
  0x21   : > { %p1623_p7 = pnand %p1622_p4, %p1616_p5 }
  0x23   : > { %1626 = shalt.err (!%p1623_p7)
}
  0x24   : > { %s1720_s22 = smov 128   ;;  %s1721_s23 = smov 8  }
  0x25   : > { %1497 = dma.hbm_to_vmem [thread:$0]  (!%p1803_p9), %s2204_s1, 512, %s214_s12, [#allocation3], %s1720_s22, %s1720_s22, %s1721_s23  }
  0x26   : > { %p2216_p10 = scmp.ne.s32.totalorder %s2214_s10, 0 }
  0x27   : > { %p2217_p12 = scmp.eq.s32.totalorder (!%p2216_p10), %s1778_s27, 0 }
  0x28   : > { %261 = sbr.rel (%p2216_p10) target bundleno = 814 (0x32e), region = 48 }
  0x2f   : > { %1672 = dma.done.wait (%p2217_p12), [#allocation3], 512   ;;  %p2218_p11 = pmov %p2217_p12 }
  0x30   : > { %s1830_s30 = smul.u32 13, %s1778_s27  ;;  %v1722_v0 = vmov 0.0|0.0   ;;  %vm1723_vm0 = vmmov 0   ;;  %v1724_v1 = vmov 0.0   ;;  %v328_v2 = vld [vmem:[#allocation2] sm:$0xff]  ;;  %v329_v3 = vld [vmem:[#allocation2 + $0x8] sm:$0xff] }
  0x31   : > { %1674 = vsyncadd (%p2218_p11), [#allocation3], 4294966784  ;;  %1431 = vmatprep.subr.bf16.mxu0 %v1722_v0  ;;  %1250 = vmatprep.mubr.msk.f32.mxu0 %vm1723_vm0, %v1724_v1  ;;  %v330_v4 = vld [vmem:[#allocation2 + $0x10] sm:$0xff]  ;;  %v1432_v5 = vpack.c.bf16 %v329_v3, %v328_v2  ;;  %v331_v6 = vld [vmem:[#allocation2 + $0x18] sm:$0xff]  ;;  %vm339_vm1 = vcmask 261120   ;;  %s293_s20 = sand.u32 1, %s1677_s24  }
  0x32   : > { %p301_p4 = scmp.lt.s32.totalorder %s1830_s30, 24  ;;  %1485 = vmatprep.subr.bf16.mxu1 %v1722_v0  ;;  %1274 = vmatprep.mubr.msk.f32.mxu1 %vm1723_vm0, %v1724_v1  ;;  %v1435_v7 = vpack.c.bf16 %v331_v6, %v330_v4  ;;  %v522_v8 = vld [vmem:[%s2206_s3] sm:$0xff]  ;;  %v523_v9 = vld [vmem:[%s2206_s3 + $0x8] sm:$0xff]  ;;  %v524_v13 = vld [vmem:[%s2206_s3 + $0x10] sm:$0xff]  ;;  %s1489_s21 = smul.u32 104, %s293_s20 }
  0x33   : > { %1433 = vmatpush3.bf16.msra.mxu0 %v1432_v5  ;;  %1487 = vmatpush3.bf16.msra.mxu1 %v1432_v5  ;;  %v1438_v12 = vpack.c.bf16 %v523_v9, %v522_v8  ;;  %v525_v14 = vld [vmem:[%s2206_s3 + $0x18] sm:$0xff]  ;;  %v526_v18 = vld [vmem:[%s2206_s3 + $0x20] sm:$0xff]  ;;  %v527_v19 = vld [vmem:[%s2206_s3 + $0x28] sm:$0xff]  ;;  %p2219_p6 = scmp.ne.s32.totalorder %s2213_s9, 0 }
  0x34   : > { %s302_s10 = scalar_select %p301_p4, %s1830_s30, 24  ;;  %1434 = vmatprep.subr.bf16.mxu0 %v1722_v0  ;;  %1486 = vmatprep.subr.bf16.mxu1 %v1722_v0  ;;  %v1441_v17 = vpack.c.bf16 %v525_v14, %v524_v13  ;;  %v1444_v22 = vpack.c.bf16 %v527_v19, %v526_v18  ;;  %v528_v23 = vld [vmem:[%s2206_s3 + $0x30] sm:$0xff]  ;;  %v529_v24 = vld [vmem:[%s2206_s3 + $0x38] sm:$0xff]  ;;  %v530_v28 = vld [vmem:[%s2206_s3 + $0x40] sm:$0xff] }
  0x35   : > { %v1447_v27 = vpack.c.bf16 %v529_v24, %v528_v23  ;;  %v531_v29 = vld [vmem:[%s2206_s3 + $0x48] sm:$0xff]  ;;  %v532_v33 = vld [vmem:[%s2206_s3 + $0x50] sm:$0xff]  ;;  %v533_v34 = vld [vmem:[%s2206_s3 + $0x58] sm:$0xff]  ;;  %s2099_s26 = scalar_lea.vmem [#allocation4], %s1489_s21   ;;  %s862_s24 = ssub.s32 (%p2219_p6), 25, %s1830_s30 }
  0x36   : > { %s1137_s11 = sshll.u32 %s302_s10, 3  ;;  %v1450_v32 = vpack.c.bf16 %v531_v29, %v530_v28  ;;  %v1453_v36 = vpack.c.bf16 %v533_v34, %v532_v33  ;;  %v534_v37 = vld [vmem:[%s2206_s3 + $0x60] sm:$0xff]  ;;  %v535_v38 = vld [vmem:[%s2206_s3 + $0x68] sm:$0xff]  ;;  %v536_v42 = vld [vmem:[%s2206_s3 + $0x70] sm:$0xff]  ;;  %s1166_s29 = smul.u32 (%p2219_p6), 104, %s1778_s27 }
  0x37   : > { %s1844_s14 = scalar_lea.vmem %s2203_s0, %s1137_s11  ;;  %1436 = vmatpush3.bf16.msra.mxu0 %v1435_v7  ;;  %1488 = vmatpush3.bf16.msra.mxu1 %v1435_v7  ;;  %v1456_v40 = vpack.c.bf16 %v535_v38, %v534_v37  ;;  %v537_v43 = vld [vmem:[%s2206_s3 + $0x78] sm:$0xff]  ;;  %v688_v45 = vld [vmem:[%s2208_s5] sm:$0xff]  ;;  %v689_v46 = vld [vmem:[%s2208_s5 + $0x8] sm:$0xff]  ;;  %p863_p7 = scmp.lt.s32.totalorder (%p2219_p6), %s862_s24, 13 }
  0x38   : > { %v315_v10 = vld [vmem:[%s1844_s14] sm:$0xff]  ;;  %1437 = vmatprep.subr.bf16.mxu1 %v1722_v0  ;;  %1461 = vmatprep.subr.bf16.mxu0 %v1722_v0  ;;  %v316_v15 = vld [vmem:[%s1844_s14 + $0x8] sm:$0xff]  ;;  %v317_v20 = vld [vmem:[%s1844_s14 + $0x10] sm:$0xff]  ;;  %v1459_v44 = vpack.c.bf16 %v537_v43, %v536_v42  ;;  %v1462_v48 = vpack.c.bf16 %v689_v46, %v688_v45  ;;  %s2121_s12 = scalar_lea.vmem (%p2219_p6), %s2210_s7, %s1166_s29  }
  0x39   : > { %v323_v11 = vld [vmem:[%s1844_s14 + $0x40] sm:$0xff]  ;;  %v324_v16 = vld [vmem:[%s1844_s14 + $0x48] sm:$0xff]  ;;  %v325_v21 = vld [vmem:[%s1844_s14 + $0x50] sm:$0xff] }
  0x3a   : > { %1251 = vmatmul.mubr.msk.f32.vlgmr.msra.gmra.mrb[0].mxu0 %vm339_vm1, %v315_v10  ;;  %1275 = vmatmul.mubr.msk.f32.vlgmr.msra.gmra.mrb[0].mxu1 %vm339_vm1, %v323_v11  ;;  %v318_v25 = vld [vmem:[%s1844_s14 + $0x18] sm:$0xff]  ;;  %v319_v30 = vld [vmem:[%s1844_s14 + $0x20] sm:$0xff]  ;;  %v320_v35 = vld [vmem:[%s1844_s14 + $0x28] sm:$0xff] }
  0x3b   : > { %1253 = vmatprep.mubr.msk.f32.mxu0 %vm1723_vm0, %v1724_v1  ;;  %1277 = vmatprep.mubr.msk.f32.mxu1 %vm1723_vm0, %v1724_v1  ;;  %v326_v26 = vld [vmem:[%s1844_s14 + $0x58] sm:$0xff]  ;;  %v327_v31 = vld [vmem:[%s1844_s14 + $0x60] sm:$0xff]  ;;  %v321_v39 = vld [vmem:[%s1844_s14 + $0x30] sm:$0xff] }
  0x3c   : > { %1439 = vmatpush3.bf16.msra.mxu1 %v1438_v12  ;;  %v322_v41 = vld [vmem:[%s1844_s14 + $0x38] sm:$0xff]  ;;  %v690_v47 = vld [vmem:[%s2208_s5 + $0x10] sm:$0xff]  ;;  %1463 = vmatpush3.bf16.msra.mxu0 %v1462_v48  ;;  %v692_v51 = vld [vmem:[%s2208_s5 + $0x20] sm:$0xff] }
  0x3d   : > { %1440 = vmatprep.subr.bf16.mxu1 %v1722_v0  ;;  %v691_v49 = vld [vmem:[%s2208_s5 + $0x18] sm:$0xff]  ;;  %1464 = vmatprep.subr.bf16.mxu0 %v1722_v0  ;;  %v693_v52 = vld [vmem:[%s2208_s5 + $0x28] sm:$0xff]  ;;  %v694_v54 = vld [vmem:[%s2208_s5 + $0x30] sm:$0xff] }
  0x3e   : > { %1254 = vmatmul.mubr.msk.f32.gmra.mrb[2].mxu0 %vm339_vm1, %v316_v15  ;;  %1278 = vmatmul.mubr.msk.f32.gmra.mrb[2].mxu1 %vm339_vm1, %v324_v16  ;;  %v1465_v50 = vpack.c.bf16 %v691_v49, %v690_v47  ;;  %v1468_v53 = vpack.c.bf16 %v693_v52, %v692_v51  ;;  %v695_v55 = vld [vmem:[%s2208_s5 + $0x38] sm:$0xff]  ;;  %v696_v57 = vld [vmem:[%s2208_s5 + $0x40] sm:$0xff]  ;;  %v697_v58 = vld [vmem:[%s2208_s5 + $0x48] sm:$0xff] }
  0x3f   : > { %1256 = vmatprep.mubr.msk.f32.mxu0 %vm1723_vm0, %v1724_v1  ;;  %1280 = vmatprep.mubr.msk.f32.mxu1 %vm1723_vm0, %v1724_v1  ;;  %v1471_v56 = vpack.c.bf16 %v695_v55, %v694_v54  ;;  %v1474_v59 = vpack.c.bf16 %v697_v58, %v696_v57  ;;  %v698_v60 = vld [vmem:[%s2208_s5 + $0x50] sm:$0xff]  ;;  %v699_v61 = vld [vmem:[%s2208_s5 + $0x58] sm:$0xff]  ;;  %v700_v63 = vld [vmem:[%s2208_s5 + $0x60] sm:$0xff] }
  0x40   : > { %1442 = vmatpush3.bf16.msra.mxu1 %v1441_v17  ;;  %1466 = vmatpush3.bf16.msra.mxu0 %v1465_v50  ;;  %v1477_v62 = vpack.c.bf16 %v699_v61, %v698_v60  ;;  %v701_v2 = vld [vmem:[%s2208_s5 + $0x68] sm:$0xff]  ;;  %v2008_v4 = vld [vmem:[%s2205_s2] ss:$0 sm:$0xff]  ;;  %v703_v57 = vld [vmem:[%s2208_s5 + $0x78] sm:$0xff] }
  0x41   : > { %1443 = vmatprep.subr.bf16.mxu1 %v1722_v0  ;;  %1467 = vmatprep.subr.bf16.mxu0 %v1722_v0  ;;  %v1480_v3 = vpack.c.bf16 %v701_v2, %v700_v63 }
  0x42   : > { %1257 = vmatmul.mubr.msk.f32.gmra.mrb[4].mxu0 %vm339_vm1, %v317_v20  ;;  %1281 = vmatmul.mubr.msk.f32.gmra.mrb[4].mxu1 %vm339_vm1, %v325_v21 }
  0x43   : > { %1259 = vmatprep.mubr.msk.f32.mxu0 %vm1723_vm0, %v1724_v1  ;;  %1283 = vmatprep.mubr.msk.f32.mxu1 %vm1723_vm0, %v1724_v1 }
  0x44   : > { %1445 = vmatpush3.bf16.msra.mxu1 %v1444_v22  ;;  %1469 = vmatpush3.bf16.msra.mxu0 %v1468_v53 }
  0x45   : > { %1446 = vmatprep.subr.bf16.mxu1 %v1722_v0  ;;  %1470 = vmatprep.subr.bf16.mxu0 %v1722_v0 }
  0x46   : > { %1260 = vmatmul.mubr.msk.f32.gmra.mrb[6].mxu0 %vm339_vm1, %v318_v25  ;;  %1284 = vmatmul.mubr.msk.f32.gmra.mrb[6].mxu1 %vm339_vm1, %v326_v26 }
  0x47   : > { %1262 = vmatprep.mubr.msk.f32.mxu0 %vm1723_vm0, %v1724_v1  ;;  %1286 = vmatprep.mubr.msk.f32.mxu1 %vm1723_vm0, %v1724_v1 }
  0x48   : > { %1448 = vmatpush3.bf16.msra.mxu1 %v1447_v27  ;;  %1472 = vmatpush3.bf16.msra.mxu0 %v1471_v56  ;;  %v702_v56 = vld [vmem:[%s2208_s5 + $0x70] sm:$0xff] }
  0x49   : > { %1449 = vmatprep.subr.bf16.mxu1 %v1722_v0  ;;  %1473 = vmatprep.subr.bf16.mxu0 %v1722_v0  ;;  %v1483_v58 = vpack.c.bf16 %v703_v57, %v702_v56 }
  0x4a   : > { %1263 = vmatmul.mubr.msk.f32.gmra.mrb[8].mxu0 %vm339_vm1, %v319_v30  ;;  %1287 = vmatmul.mubr.msk.f32.gmra.mrb[8].mxu1 %vm339_vm1, %v327_v31 }
  0x4b   : > { %1265 = vmatprep.mubr.msk.f32.mxu0 %vm1723_vm0, %v1724_v1  ;;  %1321 = vmatprep.mubr.msk.f32.mxu1 %vm1723_vm0, %v1724_v1 }
  0x4c   : > { %1451 = vmatpush3.bf16.msra.mxu1 %v1450_v32  ;;  %1475 = vmatpush3.bf16.msra.mxu0 %v1474_v59  ;;  %v2056_v59 = vld [vmem:[%s2207_s4] ss:$0 sm:$0xff] }
  0x4d   : > { %1452 = vmatprep.subr.bf16.mxu1 %v1722_v0  ;;  %1476 = vmatprep.subr.bf16.mxu0 %v1722_v0 }
  0x4e   : > { %1266 = vmatmul.mubr.msk.f32.gmra.mrb[10].mxu0 %vm339_vm1, %v320_v35 }
  0x4f   : > { %1268 = vmatprep.mubr.msk.f32.mxu0 %vm1723_vm0, %v1724_v1 }
  0x50   : > { %1454 = vmatpush3.bf16.msra.mxu1 %v1453_v36  ;;  %1478 = vmatpush3.bf16.msra.mxu0 %v1477_v62 }
  0x51   : > { %1455 = vmatprep.subr.bf16.mxu1 %v1722_v0  ;;  %1479 = vmatprep.subr.bf16.mxu0 %v1722_v0 }
  0x52   : > { %1269 = vmatmul.mubr.msk.f32.gmra.mrb[12].mxu0 %vm339_vm1, %v321_v39 }
  0x53   : > { %1271 = vmatprep.mubr.msk.f32.mxu0 %vm1723_vm0, %v1724_v1 }
  0x54   : > { %1457 = vmatpush3.bf16.msra.mxu1 %v1456_v40  ;;  %1481 = vmatpush3.bf16.msra.mxu0 %v1480_v3 }
  0x55   : > { %1458 = vmatprep.subr.bf16.mxu1 %v1722_v0  ;;  %1482 = vmatprep.subr.bf16.mxu0 %v1722_v0 }
  0x56   : > { %1272 = vmatmul.mubr.msk.f32.gmra.mrb[14].mxu0 %vm339_vm1, %v322_v41 }
  0x57   : > { %1392 = vmatprep.mubr.msk.f32.mxu0 %vm1723_vm0, %v1724_v1 }
  0x58   : > { %1460 = vmatpush3.bf16.msra.mxu1 %v1459_v44  ;;  %1484 = vmatpush3.bf16.msra.mxu0 %v1483_v58 }
 0x10d   : > { %v445_v5 = vpop.f32.mrb[0].mxu0  ;;  %v485_v6 = vpop.f32.mrb[0].mxu1 }
 0x10e   : > { %v446_v7 = vadd.f32 %v2008_v4, %v445_v5  ;;  %v1252_v8 = vpop.f32.mrb[1].mxu0  ;;  %v1276_v9 = vpop.f32.mrb[1].mxu1  ;;  %v486_v45 = vadd.f32 %v2008_v4, %v485_v6 }
 0x110   : > { %v509_v10 = vmax.f32 %v446_v7, 0.0  ;;  %v517_v47 = vmax.f32 %v486_v45, 0.0 }
 0x111   : > { %v450_v11 = vpop.f32.mrb[2].mxu0  ;;  %v490_v12 = vpop.f32.mrb[2].mxu1 }
 0x112   : > { %v451_v13 = vadd.f32 %v2008_v4, %v450_v11  ;;  %v1255_v14 = vpop.f32.mrb[3].mxu0  ;;  %1322 = vmatmul.mubr.f32.vlgmr.msra.gmra.mrb[10].mxu1 %v509_v10  ;;  %v1279_v15 = vpop.f32.mrb[3].mxu1  ;;  %v491_v48 = vadd.f32 %v2008_v4, %v490_v12 }
 0x113   : > { %1324 = vmatprep.mubr.msk.f32.mxu1 %vm1723_vm0, %v1724_v1 }
 0x114   : > { %v510_v0 = vmax.f32 %v451_v13, 0.0  ;;  %v518_v49 = vmax.f32 %v491_v48, 0.0 }
 0x115   : > { %v455_v16 = vpop.f32.mrb[4].mxu0  ;;  %v495_v17 = vpop.f32.mrb[4].mxu1 }
 0x116   : > { %v456_v18 = vadd.f32 %v2008_v4, %v455_v16  ;;  %v1258_v19 = vpop.f32.mrb[5].mxu0  ;;  %1325 = vmatmul.mubr.f32.gmra.mrb[12].mxu1 %v510_v0  ;;  %v1282_v20 = vpop.f32.mrb[5].mxu1  ;;  %v496_v50 = vadd.f32 %v2008_v4, %v495_v17 }
 0x117   : > { %1327 = vmatprep.mubr.msk.f32.mxu1 %vm1723_vm0, %v1724_v1 }
 0x118   : > { %v511_v21 = vmax.f32 %v456_v18, 0.0  ;;  %v519_v51 = vmax.f32 %v496_v50, 0.0 }
 0x119   : > { %v460_v22 = vpop.f32.mrb[6].mxu0  ;;  %v500_v23 = vpop.f32.mrb[6].mxu1 }
 0x11a   : > { %v461_v24 = vadd.f32 %v2008_v4, %v460_v22  ;;  %v1261_v25 = vpop.f32.mrb[7].mxu0  ;;  %1328 = vmatmul.mubr.f32.gmra.mrb[14].mxu1 %v511_v21  ;;  %v1285_v26 = vpop.f32.mrb[7].mxu1  ;;  %v501_v52 = vadd.f32 %v2008_v4, %v500_v23 }
 0x11b   : > { %1330 = vmatprep.mubr.msk.f32.mxu1 %vm1723_vm0, %v1724_v1 }
 0x11c   : > { %v512_v27 = vmax.f32 %v461_v24, 0.0  ;;  %v520_v53 = vmax.f32 %v501_v52, 0.0 }
 0x11d   : > { %v465_v28 = vpop.f32.mrb[8].mxu0  ;;  %v505_v29 = vpop.f32.mrb[8].mxu1 }
 0x11e   : > { %v466_v30 = vadd.f32 %v2008_v4, %v465_v28  ;;  %v1264_v31 = vpop.f32.mrb[9].mxu0  ;;  %1331 = vmatmul.mubr.f32.gmra.mrb[16].mxu1 %v512_v27  ;;  %v1288_v32 = vpop.f32.mrb[9].mxu1  ;;  %v506_v54 = vadd.f32 %v2008_v4, %v505_v29 }
 0x11f   : > { %1333 = vmatprep.mubr.msk.f32.mxu1 %vm1723_vm0, %v1724_v1 }
 0x120   : > { %v513_v33 = vmax.f32 %v466_v30, 0.0  ;;  %v521_v55 = vmax.f32 %v506_v54, 0.0 }
 0x121   : > { %v470_v34 = vpop.f32.mrb[10].mxu0 }
 0x122   : > { %v471_v35 = vadd.f32 %v2008_v4, %v470_v34  ;;  %v1267_v36 = vpop.f32.mrb[11].mxu0  ;;  %1334 = vmatmul.mubr.f32.gmra.mrb[18].mxu1 %v513_v33 }
 0x123   : > { %1336 = vmatprep.mubr.msk.f32.mxu1 %vm1723_vm0, %v1724_v1 }
 0x124   : > { %v514_v37 = vmax.f32 %v471_v35, 0.0 }
 0x125   : > { %v475_v38 = vpop.f32.mrb[12].mxu0 }
 0x126   : > { %v476_v39 = vadd.f32 %v2008_v4, %v475_v38  ;;  %v1270_v40 = vpop.f32.mrb[13].mxu0  ;;  %1337 = vmatmul.mubr.f32.gmra.mrb[20].mxu1 %v514_v37 }
 0x127   : > { %1339 = vmatprep.mubr.msk.f32.mxu1 %vm1723_vm0, %v1724_v1 }
 0x128   : > { %v515_v41 = vmax.f32 %v476_v39, 0.0 }
 0x129   : > { %v480_v42 = vpop.f32.mrb[14].mxu0 }
 0x12a   : > { %v481_v43 = vadd.f32 %v2008_v4, %v480_v42  ;;  %v1273_v44 = vpop.f32.mrb[15].mxu0  ;;  %1340 = vmatmul.mubr.f32.gmra.mrb[22].mxu1 %v515_v41 }
 0x12b   : > { %1342 = vmatprep.mubr.msk.f32.mxu1 %vm1723_vm0, %v1724_v1 }
 0x12c   : > { %v516_v46 = vmax.f32 %v481_v43, 0.0 }
 0x12e   : > { %1343 = vmatmul.mubr.f32.gmra.mrb[24].mxu1 %v516_v46 }
 0x12f   : > { %1345 = vmatprep.mubr.msk.f32.mxu1 %vm1723_vm0, %v1724_v1 }
 0x132   : > { %1346 = vmatmul.mubr.f32.gmra.mrb[26].mxu1 %v517_v47 }
 0x133   : > { %1348 = vmatprep.mubr.msk.f32.mxu1 %vm1723_vm0, %v1724_v1 }
 0x136   : > { %1349 = vmatmul.mubr.f32.gmra.mrb[28].mxu1 %v518_v49  ;;  %v1153_v49 = vld [vmem:[%s2209_s6] ss:$0 sm:$0xff] }
 0x137   : > { %1351 = vmatprep.mubr.msk.f32.mxu1 %vm1723_vm0, %v1724_v1 }
 0x13a   : > { %1352 = vmatmul.mubr.f32.gmra.mrb[30].mxu1 %v519_v51 }
 0x13b   : > { %1354 = vmatprep.mubr.msk.f32.mxu1 %vm1723_vm0, %v1724_v1 }
 0x13e   : > { %1355 = vmatmul.mubr.f32.gmra.mrb[32].mxu1 %v520_v53 }
 0x13f   : > { %1357 = vmatprep.mubr.msk.f32.mxu1 %vm1723_vm0, %v1724_v1 }
 0x142   : > { %1358 = vmatmul.mubr.f32.gmra.mrb[34].mxu1 %v521_v55 }
 0x1e5   : > { %v611_v60 = vpop.f32.mrb[10].mxu1 }
 0x1e6   : > { %v612_v61 = vadd.f32 %v2056_v59, %v611_v60  ;;  %v1323_v62 = vpop.f32.mrb[11].mxu1 }
 0x1e8   : > { %v675_v63 = vmax.f32 %v612_v61, 0.0 }
 0x1e9   : > { %v616_v2 = vpop.f32.mrb[12].mxu1 }
 0x1ea   : > { %v617_v3 = vadd.f32 %v2056_v59, %v616_v2  ;;  %v1326_v4 = vpop.f32.mrb[13].mxu1  ;;  %1393 = vmatmul.mubr.f32.vlgmr.msra.gmra.mrb[16].mxu0 %v675_v63 }
 0x1eb   : > { %1395 = vmatprep.mubr.msk.f32.mxu0 %vm1723_vm0, %v1724_v1 }
 0x1ec   : > { %v676_v5 = vmax.f32 %v617_v3, 0.0 }
 0x1ed   : > { %v621_v6 = vpop.f32.mrb[14].mxu1 }
 0x1ee   : > { %v622_v7 = vadd.f32 %v2056_v59, %v621_v6  ;;  %v1329_v8 = vpop.f32.mrb[15].mxu1  ;;  %1396 = vmatmul.mubr.f32.gmra.mrb[18].mxu0 %v676_v5 }
 0x1ef   : > { %1398 = vmatprep.mubr.msk.f32.mxu0 %vm1723_vm0, %v1724_v1 }
 0x1f0   : > { %v677_v9 = vmax.f32 %v622_v7, 0.0 }
 0x1f1   : > { %v626_v10 = vpop.f32.mrb[16].mxu1 }
 0x1f2   : > { %v627_v11 = vadd.f32 %v2056_v59, %v626_v10  ;;  %v1332_v12 = vpop.f32.mrb[17].mxu1  ;;  %1399 = vmatmul.mubr.f32.gmra.mrb[20].mxu0 %v677_v9 }
 0x1f3   : > { %1401 = vmatprep.mubr.msk.f32.mxu0 %vm1723_vm0, %v1724_v1 }
 0x1f4   : > { %v678_v13 = vmax.f32 %v627_v11, 0.0 }
 0x1f5   : > { %v631_v14 = vpop.f32.mrb[18].mxu1 }
 0x1f6   : > { %v632_v15 = vadd.f32 %v2056_v59, %v631_v14  ;;  %v1335_v0 = vpop.f32.mrb[19].mxu1  ;;  %1402 = vmatmul.mubr.f32.gmra.mrb[22].mxu0 %v678_v13 }
 0x1f7   : > { %1404 = vmatprep.mubr.msk.f32.mxu0 %vm1723_vm0, %v1724_v1 }
 0x1f8   : > { %v679_v16 = vmax.f32 %v632_v15, 0.0 }
 0x1f9   : > { %v636_v17 = vpop.f32.mrb[20].mxu1 }
 0x1fa   : > { %v637_v18 = vadd.f32 %v2056_v59, %v636_v17  ;;  %v1338_v19 = vpop.f32.mrb[21].mxu1  ;;  %1405 = vmatmul.mubr.f32.gmra.mrb[24].mxu0 %v679_v16 }
 0x1fb   : > { %1407 = vmatprep.mubr.msk.f32.mxu0 %vm1723_vm0, %v1724_v1 }
 0x1fc   : > { %v680_v20 = vmax.f32 %v637_v18, 0.0 }
 0x1fd   : > { %v641_v21 = vpop.f32.mrb[22].mxu1 }
 0x1fe   : > { %v642_v22 = vadd.f32 %v2056_v59, %v641_v21  ;;  %v1341_v23 = vpop.f32.mrb[23].mxu1  ;;  %1408 = vmatmul.mubr.f32.gmra.mrb[26].mxu0 %v680_v20 }
 0x1ff   : > { %1410 = vmatprep.mubr.msk.f32.mxu0 %vm1723_vm0, %v1724_v1 }
 0x200   : > { %v681_v24 = vmax.f32 %v642_v22, 0.0 }
 0x201   : > { %v646_v25 = vpop.f32.mrb[24].mxu1 }
 0x202   : > { %v647_v26 = vadd.f32 %v2056_v59, %v646_v25  ;;  %v1344_v27 = vpop.f32.mrb[25].mxu1  ;;  %1411 = vmatmul.mubr.f32.gmra.mrb[28].mxu0 %v681_v24 }
 0x203   : > { %1413 = vmatprep.mubr.msk.f32.mxu0 %vm1723_vm0, %v1724_v1 }
 0x204   : > { %v682_v28 = vmax.f32 %v647_v26, 0.0 }
 0x205   : > { %v651_v29 = vpop.f32.mrb[26].mxu1 }
 0x206   : > { %v652_v30 = vadd.f32 %v2056_v59, %v651_v29  ;;  %v1347_v31 = vpop.f32.mrb[27].mxu1  ;;  %1414 = vmatmul.mubr.f32.gmra.mrb[30].mxu0 %v682_v28 }
 0x207   : > { %1416 = vmatprep.mubr.msk.f32.mxu0 %vm1723_vm0, %v1724_v1 }
 0x208   : > { %v683_v32 = vmax.f32 %v652_v30, 0.0 }
 0x209   : > { %v656_v33 = vpop.f32.mrb[28].mxu1 }
 0x20a   : > { %v657_v34 = vadd.f32 %v2056_v59, %v656_v33  ;;  %v1350_v35 = vpop.f32.mrb[29].mxu1  ;;  %1417 = vmatmul.mubr.f32.gmra.mrb[32].mxu0 %v683_v32 }
 0x20b   : > { %1419 = vmatprep.mubr.msk.f32.mxu0 %vm1723_vm0, %v1724_v1 }
 0x20c   : > { %v684_v36 = vmax.f32 %v657_v34, 0.0 }
 0x20d   : > { %v661_v37 = vpop.f32.mrb[30].mxu1 }
 0x20e   : > { %v662_v38 = vadd.f32 %v2056_v59, %v661_v37  ;;  %v1353_v39 = vpop.f32.mrb[31].mxu1  ;;  %1420 = vmatmul.mubr.f32.gmra.mrb[34].mxu0 %v684_v36 }
 0x20f   : > { %1422 = vmatprep.mubr.msk.f32.mxu0 %vm1723_vm0, %v1724_v1 }
 0x210   : > { %v685_v40 = vmax.f32 %v662_v38, 0.0 }
 0x211   : > { %v666_v41 = vpop.f32.mrb[32].mxu1 }
 0x212   : > { %v667_v42 = vadd.f32 %v2056_v59, %v666_v41  ;;  %v1356_v43 = vpop.f32.mrb[33].mxu1  ;;  %1423 = vmatmul.mubr.f32.gmra.mrb[36].mxu0 %v685_v40 }
 0x213   : > { %1425 = vmatprep.mubr.msk.f32.mxu0 %vm1723_vm0, %v1724_v1 }
 0x214   : > { %v686_v44 = vmax.f32 %v667_v42, 0.0 }
 0x215   : > { %v671_v45 = vpop.f32.mrb[34].mxu1 }
 0x216   : > { %v672_v46 = vadd.f32 %v2056_v59, %v671_v45  ;;  %v1359_v47 = vpop.f32.mrb[35].mxu1  ;;  %1426 = vmatmul.mubr.f32.gmra.mrb[38].mxu0 %v686_v44 }
 0x217   : > { %1428 = vmatprep.mubr.msk.f32.mxu0 %vm1723_vm0, %v1724_v1 }
 0x218   : > { %v687_v48 = vmax.f32 %v672_v46, 0.0 }
 0x21a   : > { %1429 = vmatmul.mubr.f32.gmra.mrb[40].mxu0 %v687_v48 }
 0x2bd   : > { %v777_v50 = vpop.f32.mrb[16].mxu0 }
 0x2be   : > { %v778_v51 = vadd.f32 %v1153_v49, %v777_v50  ;;  %v1394_v52 = vpop.f32.mrb[17].mxu0 }
 0x2c0   : > { %841 = vst [vmem:[%s2099_s26] sm:$0xff] %v778_v51 }
 0x2c1   : > { %v782_v1 = vpop.f32.mrb[18].mxu0 }
 0x2c2   : > { %v783_v53 = vadd.f32 %v1153_v49, %v782_v1  ;;  %v1397_v54 = vpop.f32.mrb[19].mxu0 }
 0x2c4   : > { %842 = vst [vmem:[%s2099_s26 + $0x8] sm:$0xff] %v783_v53 }
 0x2c5   : > { %v787_v55 = vpop.f32.mrb[20].mxu0 }
 0x2c6   : > { %v788_v56 = vadd.f32 %v1153_v49, %v787_v55  ;;  %v1400_v57 = vpop.f32.mrb[21].mxu0 }
 0x2c8   : > { %843 = vst [vmem:[%s2099_s26 + $0x10] sm:$0xff] %v788_v56 }
 0x2c9   : > { %v792_v58 = vpop.f32.mrb[22].mxu0 }
 0x2ca   : > { %v793_v59 = vadd.f32 %v1153_v49, %v792_v58  ;;  %v1403_v60 = vpop.f32.mrb[23].mxu0 }
 0x2cc   : > { %844 = vst [vmem:[%s2099_s26 + $0x18] sm:$0xff] %v793_v59 }
 0x2cd   : > { %v797_v61 = vpop.f32.mrb[24].mxu0 }
 0x2ce   : > { %v798_v62 = vadd.f32 %v1153_v49, %v797_v61  ;;  %v1406_v63 = vpop.f32.mrb[25].mxu0 }
 0x2d0   : > { %845 = vst [vmem:[%s2099_s26 + $0x20] sm:$0xff] %v798_v62 }
 0x2d1   : > { %v802_v2 = vpop.f32.mrb[26].mxu0 }
 0x2d2   : > { %v803_v3 = vadd.f32 %v1153_v49, %v802_v2  ;;  %v1409_v4 = vpop.f32.mrb[27].mxu0 }
 0x2d4   : > { %846 = vst [vmem:[%s2099_s26 + $0x28] sm:$0xff] %v803_v3 }
 0x2d5   : > { %v807_v5 = vpop.f32.mrb[28].mxu0 }
 0x2d6   : > { %v808_v6 = vadd.f32 %v1153_v49, %v807_v5  ;;  %v1412_v7 = vpop.f32.mrb[29].mxu0 }
 0x2d8   : > { %847 = vst [vmem:[%s2099_s26 + $0x30] sm:$0xff] %v808_v6 }
 0x2d9   : > { %v812_v8 = vpop.f32.mrb[30].mxu0 }
 0x2da   : > { %v813_v9 = vadd.f32 %v1153_v49, %v812_v8  ;;  %v1415_v10 = vpop.f32.mrb[31].mxu0 }
 0x2dc   : > { %848 = vst [vmem:[%s2099_s26 + $0x38] sm:$0xff] %v813_v9 }
 0x2dd   : > { %v817_v11 = vpop.f32.mrb[32].mxu0 }
 0x2de   : > { %v818_v12 = vadd.f32 %v1153_v49, %v817_v11  ;;  %v1418_v13 = vpop.f32.mrb[33].mxu0 }
 0x2e0   : > { %849 = vst [vmem:[%s2099_s26 + $0x40] sm:$0xff] %v818_v12 }
 0x2e1   : > { %v822_v14 = vpop.f32.mrb[34].mxu0 }
 0x2e2   : > { %v823_v15 = vadd.f32 %v1153_v49, %v822_v14  ;;  %v1421_v0 = vpop.f32.mrb[35].mxu0 }
 0x2e4   : > { %850 = vst [vmem:[%s2099_s26 + $0x48] sm:$0xff] %v823_v15 }
 0x2e5   : > { %v827_v16 = vpop.f32.mrb[36].mxu0 }
 0x2e6   : > { %v828_v17 = vadd.f32 %v1153_v49, %v827_v16  ;;  %v1424_v18 = vpop.f32.mrb[37].mxu0 }
 0x2e8   : > { %851 = vst [vmem:[%s2099_s26 + $0x50] sm:$0xff] %v828_v17 }
 0x2e9   : > { %v832_v19 = vpop.f32.mrb[38].mxu0 }
 0x2ea   : > { %v833_v20 = vadd.f32 %v1153_v49, %v832_v19  ;;  %v1427_v21 = vpop.f32.mrb[39].mxu0  ;;  %860 = sbr.rel (!%p2219_p6) target bundleno = 814 (0x32e), region = 56 }
 0x2ec   : > { %852 = vst [vmem:[%s2099_s26 + $0x58] sm:$0xff] %v833_v20 }
 0x2ed   : > { %v837_v22 = vpop.f32.mrb[40].mxu0 }
 0x2ee   : > { %v838_v23 = vadd.f32 %v1153_v49, %v837_v22  ;;  %v1430_v24 = vpop.f32.mrb[41].mxu0 }
 0x2f0   : > { %853 = vst [vmem:[%s2099_s26 + $0x60] sm:$0xff] %v838_v23 }
 0x2f1   : > { %s2227_s24 = smov (!%p863_p7, %s862_s24), 13 }
 0x2f2   : > { %s1154_s13 = sshll.u32 %s2227_s24, 7 }
 0x2f3   : > { %p1157_p9 = scmp.eq.s32.totalorder %s1154_s13, 0 }
 0x2f4   : > { %1595 = sdivrem.u32 (!%p1157_p9), %s2227_s24, 13 }
 0x2f5   : > { %871 = sbr.rel (%p1157_p9) target bundleno = 814 (0x32e), region = 60 }
 0x2fd   : > { %s2127_s9 = spop.drf %1595 }
 0x2fe   : > { %p1158_p13 = scmp.le.s32.totalorder %s2127_s9, 0 }
 0x2ff   : > { %s2220_s27 = smov (!%p1158_p13), %s2121_s12  ;;  %s2221_s30 = smov (!%p1158_p13), %s2099_s26 }
 0x300   : > { %1078 = sbr.rel (%p1158_p13) target bundleno = 785 (0x311), region = 137  ;;  %s2136_s15 = smov (!%p1158_p13), 0  }
 0x301   : > { %s2138_s16 = smov (!%p1158_p13), 0  }
 0x307 LB: >> { %v959_v25 = vld [vmem:[%s1693_s30] sm:$0xff]  ;;  %v961_v26 = vld [vmem:[%s1693_s30 + $0x8] sm:$0xff]  ;;  %v963_v27 = vld [vmem:[%s1693_s30 + $0x10] sm:$0xff]  ;;  %s985_s17 = sadd.s32 1, %s1697_s15  ;;  %s953_s16 = sadd.s32 1, %s1701_s16   ;;  %s1701_s16 = sphi %s2138_s16, %s953_s16   ;;  %s1697_s15 = sphi %s2136_s15, %s2222_s15   ;;  %s1693_s30 = sphi %s2221_s30, %s990_s30   ;;  %s1689_s27 = sphi %s2220_s27, %s991_s27  }
 0x308   : >> { %960 = vst [vmem:[%s1689_s27] sm:$0xff] %v959_v25  ;;  %962 = vst [vmem:[%s1689_s27 + $0x8] sm:$0xff] %v961_v26  ;;  %v965_v28 = vld [vmem:[%s1693_s30 + $0x18] sm:$0xff]  ;;  %v967_v29 = vld [vmem:[%s1693_s30 + $0x20] sm:$0xff]  ;;  %p986_p0 = scmp.ge.s32.totalorder %s985_s17, %s2127_s9  ;;  %p952_p1 = scmp.ge.s32.totalorder %s953_s16, %s2127_s9 }
 0x309   : >> { %964 = vst [vmem:[%s1689_s27 + $0x10] sm:$0xff] %v963_v27  ;;  %v969_v30 = vld [vmem:[%s1693_s30 + $0x28] sm:$0xff]  ;;  %966 = vst [vmem:[%s1689_s27 + $0x18] sm:$0xff] %v965_v28  ;;  %v971_v31 = vld [vmem:[%s1693_s30 + $0x30] sm:$0xff] }
 0x30a   : >> { %968 = vst [vmem:[%s1689_s27 + $0x20] sm:$0xff] %v967_v29  ;;  %970 = vst [vmem:[%s1689_s27 + $0x28] sm:$0xff] %v969_v30  ;;  %v973_v32 = vld [vmem:[%s1693_s30 + $0x38] sm:$0xff]  ;;  %v975_v33 = vld [vmem:[%s1693_s30 + $0x40] sm:$0xff]  ;;  %s2229_s17 = smov (%p986_p0, %s985_s17), 0  ;;  %955 = sbr.rel (!%p952_p1) target bundleno = 775 (0x307), region = 143 }
 0x30b   : >> { %972 = vst [vmem:[%s1689_s27 + $0x30] sm:$0xff] %v971_v31  ;;  %974 = vst [vmem:[%s1689_s27 + $0x38] sm:$0xff] %v973_v32  ;;  %v977_v34 = vld [vmem:[%s1693_s30 + $0x48] sm:$0xff]  ;;  %v979_v35 = vld [vmem:[%s1693_s30 + $0x50] sm:$0xff]  ;;  %s988_s14 = smul.u32 104, %s2229_s17  ;;  %s2222_s15 = smov %s2229_s17 }
 0x30c   : >> { %976 = vst [vmem:[%s1689_s27 + $0x40] sm:$0xff] %v975_v33  ;;  %v981_v36 = vld [vmem:[%s1693_s30 + $0x58] sm:$0xff]  ;;  %978 = vst [vmem:[%s1689_s27 + $0x48] sm:$0xff] %v977_v34  ;;  %v983_v37 = vld [vmem:[%s1693_s30 + $0x60] sm:$0xff] }
 0x30d   : >> { %980 = vst [vmem:[%s1689_s27 + $0x50] sm:$0xff] %v979_v35  ;;  %982 = vst [vmem:[%s1689_s27 + $0x58] sm:$0xff] %v981_v36  ;;  %s990_s30 = scalar_lea.vmem %s2099_s26, %s988_s14 [#allocation4]  }
 0x30e   : >> { %984 = vst [vmem:[%s1689_s27 + $0x60] sm:$0xff] %v983_v37  ;;  %s991_s27 = scalar_lea.vmem %s2121_s12, %s988_s14  }
 0x311 PF: > { %1597 = sdivrem.u32 %s2227_s24, 13 }
 0x312   : > { %s1159_s18 = smul.u32 104, %s2127_s9 }
 0x314   : > { %s996_s19 = scalar_lea.vmem %s2099_s26, %s1159_s18 [#allocation4]   ;;  %s998_s20 = scalar_lea.vmem %s2121_s12, %s1159_s18  }
 0x31a   : > { %s1598_s21 = spop.drf %1597 }
 0x31b   : > { %p1161_p2 = scmp.le.s32.totalorder %s1598_s21, 0 }
 0x31c   : > { %s1703_s22 = smov (!%p1161_p2), %s998_s20   ;;  %s1707_s23 = smov (!%p1161_p2), %s996_s19  }
 0x31d   : > { %1092 = sbr.rel (%p1161_p2) target bundleno = 814 (0x32e), region = 148  ;;  %s1711_s29 = smov (!%p1161_p2), 0  }
 0x31e   : > { %s1715_s10 = smov (!%p1161_p2), 0  }
 0x324 LB: >> { %v1008_v38 = vld [vmem:[%s1709_s23] sm:$0xff]  ;;  %s1010_s11 = sadd.s32 1, %s1713_s29  ;;  %s1002_s10 = sadd.s32 1, %s1717_s10   ;;  %s1717_s10 = sphi %s1715_s10, %s1002_s10   ;;  %s1713_s29 = sphi %s1711_s29, %s1712_s29   ;;  %s1709_s23 = sphi %s1707_s23, %s1015_s23   ;;  %s1705_s22 = sphi %s1703_s22, %s1016_s22  }
 0x325   : >> { %1009 = vst [vmem:[%s1705_s22] sm:$0xff] %v1008_v38  ;;  %p1011_p3 = scmp.ge.s32.totalorder %s1010_s11, %s1598_s21  ;;  %p1001_p5 = scmp.ge.s32.totalorder %s1002_s10, %s1598_s21 }
 0x327   : >> { %s2231_s11 = smov (%p1011_p3, %s1010_s11), 0  ;;  %1004 = sbr.rel (!%p1001_p5) target bundleno = 804 (0x324), region = 154 }
 0x328   : >> { %s1162_s26 = sshll.u32 %s2231_s11, 3  ;;  %s1712_s29 = smov %s2231_s11  }
 0x329   : >> { %s1015_s23 = scalar_lea.vmem %s996_s19, %s1162_s26 [#allocation4]   ;;  %s1016_s22 = scalar_lea.vmem %s998_s20, %s1162_s26  }
 0x32e PF: > { %p15_p8 = scmp.ge.s32.totalorder %s1780_s28, 4   ;;  %s2223_s24 = smov %s1681_s25 }
 0x32f   : > { %s2224_s25 = smov %s1788_s8  ;;  %s2225_s26 = smov %s1780_s28 }
 0x330   :  { %17 = sbr.rel (!%p15_p8) target bundleno = 2 (0x2), region = 165 }
 0x337   :  { %1032 = vsyncpa [#allocation3], 1 }
 0x338   :  { %1034 = vsyncpa [#allocation3 + $0x1], 1 }

</bundles_post_ra>
